<compile_context>
chip_gen: v6e
topology: v6e:2x2x1
jax: 0.10.0
libtpu: 0.0.40
codegen_flags: <defaults>
</compile_context>

<pallas_src>
from functools import partial

import jax
import jax.numpy as jnp
from jax.experimental import pallas as pl
from jax.experimental.pallas import tpu as pltpu

NUM_FEATURES = 56          # len(full_atom_feature_dims)
VOCAB = 2                  # each full_atom_feature_dims[i] == 2
EMB_DIM = 32
ROW_TILE = 16384           # max rows of the original [N, F] matrix per grid step


def atom_encoder_kernel(x_ref, d_ref, b_ref, o_ref):
    # x_ref: (R, G*F) int8    (G original rows packed per kernel row)
    # d_ref: (G*F, G*E) bf16  block-diagonal kron(I_G, W[1]-W[0])
    # b_ref: (1, G*E)  f32    tiled bias (sum_i W[0, i, :])
    # o_ref: (R, G*E)  f32    lane-dense output (G*E == 128 when E == 32)
    x = x_ref[...].astype(jnp.bfloat16)          # {0,1} exact in bf16
    acc = jnp.dot(x, d_ref[...], preferred_element_type=jnp.float32)
    o_ref[...] = acc + b_ref[...]


def _round_up(a, m):
    return pl.cdiv(a, m) * m


@partial(jax.jit, static_argnames=("row_tile",))
def atom_encoder(x, w, *, row_tile=ROW_TILE):
    """x: [N, F] integer (values in {0,1}), w: [V=2, F, E] f32 -> [N, E] f32."""
    n, f = x.shape
    v, f2, e = w.shape
    assert f == f2 and v == VOCAB
    # Lane-dense grouping requires E | 128 (true for E = 32).
    assert e <= 128 and 128 % e == 0, "emb_dim must divide 128 for lane-dense stores"
    group = 128 // e
    row_quantum = 32 * group           # keeps grouped int8 rows on a (32,128) tile

    # Adaptive tiling: clamp for small N; >=2 steps for moderate N (v7x megacore).
    num_steps = pl.cdiv(n, row_tile)
    if num_steps < 2 and n > row_quantum:
        num_steps = 2
    row_tile_eff = _round_up(pl.cdiv(n, num_steps), row_quantum)
    num_tiles = pl.cdiv(n, row_tile_eff)
    n_pad = num_tiles * row_tile_eff

    # int8 first (values are 0/1) so pad/reshape move 1/4 the bytes; fuses under jit.
    x8 = x.astype(jnp.int8)
    if n_pad != n:
        x8 = jnp.pad(x8, ((0, n_pad - n), (0, 0)))   # pad index 0 is valid; rows dropped later
    xg = x8.reshape(n_pad // group, group * f)        # row-major grouping (metadata only)

    # Affine reparameterization of the 56 binary embedding tables.
    d = (w[1] - w[0]).astype(jnp.float32)                               # (F, E)
    bias = jnp.sum(w[0].astype(jnp.float32), axis=0)                    # (E,)
    dg = jnp.kron(jnp.eye(group, dtype=jnp.float32), d).astype(jnp.bfloat16)  # (G*F, G*E)
    biasg = jnp.tile(bias, group)[None, :]                              # (1, G*E) f32

    rg = row_tile_eff // group
    gf, ge = group * f, group * e

    cost = pl.CostEstimate(
        flops=2 * (n_pad // group) * gf * ge,
        transcendentals=0,
        bytes_accessed=n_pad * f + n_pad * e * 4 + gf * ge * 2 + ge * 4,
    )

    out_g = pl.pallas_call(
        atom_encoder_kernel,
        out_shape=jax.ShapeDtypeStruct((n_pad // group, ge), jnp.float32),
        grid_spec=pltpu.PrefetchScalarGridSpec(
            num_scalar_prefetch=0,
            grid=(num_tiles,),
            in_specs=[
                pl.BlockSpec((rg, gf), lambda i: (i, 0)),        # x tile
                pl.BlockSpec((gf, ge), lambda i: (0, 0)),        # D (resident)
                pl.BlockSpec((1, ge), lambda i: (0, 0)),         # bias (resident)
            ],
            out_specs=pl.BlockSpec((rg, ge), lambda i: (i, 0)),
        ),
        compiler_params=pltpu.CompilerParams(
            dimension_semantics=("parallel",)),   # shards row tiles across v7x's 2 TCs
        cost_estimate=cost,
    )(xg, dg, biasg)

    out = out_g.reshape(n_pad, e)
    return out[:n] if n_pad != n else out


def init_params(key, emb_dim):
    """Xavier-uniform init of the 56 Embedding(2, emb_dim) tables, stacked to [V, F, E]."""
    bound = jnp.sqrt(6.0 / (VOCAB + emb_dim))     # torch xavier_uniform, gain=1
    tables = []
    for _ in range(NUM_FEATURES):
        key, sub = jax.random.split(key)
        tables.append(jax.random.uniform(sub, (VOCAB, emb_dim),
                                         minval=-bound, maxval=bound,
                                         dtype=jnp.float32))
    # stack along feature axis -> W[v, i, e] = emb_i.weight[v, e]
    return jnp.stack(tables, axis=1)


def reference(x, w):
    # plain-JAX f32 reference of the PyTorch forward: sum_i emb_i(x[:, i])
    out = jnp.zeros((x.shape[0], w.shape[2]), jnp.float32)
    for i in range(x.shape[1]):
        out = out + w[:, i, :][x[:, i]]
    return out


if __name__ == "__main__":
    # NOTE: like PyTorch's nn.Embedding(2, E), inputs must lie in {0, 1}; out-of-range
    # values are silently mis-encoded (no index error on TPU).
    key = jax.random.PRNGKey(0)
    k_w, k_x1, k_x2 = jax.random.split(key, 3)

    W = init_params(k_w, EMB_DIM)                                  # [2, 56, 32]

    ok = True
    for n_test, k in ((16, k_x1), (37, k_x2)):                     # exercises padding path
        x = jax.random.randint(k, (n_test, NUM_FEATURES), 0, VOCAB, dtype=jnp.int32)
        out = jax.block_until_ready(atom_encoder(x, W))
        ref = reference(x, W)
        ok &= out.shape == (n_test, EMB_DIM)
        # D is stored in bf16 (accumulation f32, bias f32): expect ~1e-3-level rounding
        # vs. the exact-f32 reference, so compare with a bf16-appropriate tolerance.
        ok &= bool(jnp.allclose(out, ref, atol=2e-2, rtol=2e-2))

    assert ok
    print("KERNEL_OK")
</pallas_src>

<mosaic_0001>
module attributes {stable_mosaic.version = 11 : i64} {
  func.func @atom_encoder_kernel(%arg0: i32, %arg1: memref<32x224xi8, #tpu.memory_space<vmem>>, %arg2: memref<224x128xbf16, #tpu.memory_space<vmem>>, %arg3: memref<1x128xf32, #tpu.memory_space<vmem>>, %arg4: memref<32x128xf32, #tpu.memory_space<vmem>>) attributes {dimension_semantics = [#tpu.dimension_semantics<parallel>], iteration_bounds = array<i64: 1>, scalar_prefetch = 0 : i64, scratch_operands = 0 : i64, tpu.core_type = #tpu.core_type<tc>, window_params = [{transform_indices = @transform_0, window_bounds = array<i64: 32, 224>}, {pipeline_mode = #tpu.pipeline_mode<synchronous>, transform_indices = @transform_1, window_bounds = array<i64: 224, 128>}, {pipeline_mode = #tpu.pipeline_mode<synchronous>, transform_indices = @transform_2, window_bounds = array<i64: 1, 128>}, {transform_indices = @transform_3, window_bounds = array<i64: 32, 128>}]} {
    %c0 = arith.constant 0 : index
    %c0_0 = arith.constant 0 : index
    %0 = vector.load %arg1[%c0, %c0_0] : memref<32x224xi8, #tpu.memory_space<vmem>>, vector<32x224xi8>
    %1 = arith.sitofp %0 : vector<32x224xi8> to vector<32x224xbf16>
    %c0_1 = arith.constant 0 : index
    %c0_2 = arith.constant 0 : index
    %2 = vector.load %arg2[%c0_1, %c0_2] : memref<224x128xbf16, #tpu.memory_space<vmem>>, vector<224x128xbf16>
    %cst = arith.constant dense<0.000000e+00> : vector<32x128xf32>
    %3 = tpu.matmul %1, %2, %cst {dimension_numbers = #tpu.dot_dimension_numbers<[1], [0], [0], [1], [0, 0, 1, 1], [], []>} : vector<32x224xbf16>, vector<224x128xbf16>, vector<32x128xf32> -> vector<32x128xf32>
    %c0_3 = arith.constant 0 : index
    %c0_4 = arith.constant 0 : index
    %4 = vector.load %arg3[%c0_3, %c0_4] : memref<1x128xf32, #tpu.memory_space<vmem>>, vector<1x128xf32>
    %5 = vector.broadcast %4 : vector<1x128xf32> to vector<32x128xf32>
    %6 = arith.addf %3, %5 : vector<32x128xf32>
    %c0_5 = arith.constant 0 : index
    %c0_6 = arith.constant 0 : index
    %7 = vector.load %arg4[%c0_5, %c0_6] : memref<32x128xf32, #tpu.memory_space<vmem>>, vector<32x128xf32>
    tpu.vector_store %arg4[%c0_5, %c0_6], %6 {strides = array<i32>} : memref<32x128xf32, #tpu.memory_space<vmem>>, vector<32x128xf32>,
    return
  }
  func.func @transform_0(%arg0: i32) -> (i32, i32) {
    %c0_i32 = arith.constant 0 : i32
    %c0_i32_0 = arith.constant 0 : i32
    return %arg0, %c0_i32 : i32, i32
  }
  func.func @transform_1(%arg0: i32) -> (i32, i32) {
    %c0_i32 = arith.constant 0 : i32
    %c0_i32_0 = arith.constant 0 : i32
    %c0_i32_1 = arith.constant 0 : i32
    return %c0_i32, %c0_i32_0 : i32, i32
  }
  func.func @transform_2(%arg0: i32) -> (i32, i32) {
    %c0_i32 = arith.constant 0 : i32
    %c0_i32_0 = arith.constant 0 : i32
    %c0_i32_1 = arith.constant 0 : i32
    return %c0_i32, %c0_i32_0 : i32, i32
  }
  func.func @transform_3(%arg0: i32) -> (i32, i32) {
    %c0_i32 = arith.constant 0 : i32
    %c0_i32_0 = arith.constant 0 : i32
    return %arg0, %c0_i32 : i32, i32
  }
}

</mosaic_0001>

<bundles_post_ra>
// kernel: tile.8
= control target key start
LH: loop header
LB: loop body
LE: loop exit
PB: predicated region body
PF: predicated region fallthrough
CT: control target
= control target key end

     0   :  { %s22_s0 = inlined_call_operand.vmem [shape: f32[32], index: 0, kind: input, shape index: {}]   ;;  %s23_s1 = inlined_call_operand.vmem [shape: f32[4,32], index: 1, kind: output, shape index: {}]  }
   0x1   :  { %v4_v0 = vld [vmem:[%s22_s0] ss:$0 sm:$0xff] }
   0x2   :  { %5 = vst [vmem:[%s23_s1] sm:$0xf] %v4_v0 }

// kernel: tile.9
= control target key start
LH: loop header
LB: loop body
LE: loop exit
PB: predicated region body
PF: predicated region fallthrough
CT: control target
= control target key end

     0   :  { %vm8_vm0 = vcmask 261120   ;;  %s40_s8 = smov 32   ;;  %s41_s9 = smov 64   ;;  %vm14_vm1 = vcmask 1048320   ;;  %vm20_vm2 = vcmask 785920   ;;  %vm26_vm3 = vcmask 523520   ;;  %s58_s0 = inlined_call_operand.vmem [shape: f32[4,32], index: 0, kind: input, shape index: {}]   ;;  %s59_s1 = inlined_call_operand.vmem [shape: f32[1,128], index: 1, kind: output, shape index: {}]  }
   0x1   :  { %v5_v0 = vld [vmem:[%s58_s0] sm:$0xf]  ;;  %s39_s0 = smov 96  }
   0x2   :  { %6 = vst [vmem:[#allocation1] sm:$0xf] %v5_v0 }
   0x9   :  { %v11_v1 = vld [vmem:[#allocation1 + $0x3] sm:$0x1]   ;;  %v23_v2 = vld [vmem:[#allocation1 + $0x1] sm:$0x1]   ;;  %v7_v3 = vld [vmem:[#allocation1] sm:$0x1]  }
   0xa   :  { %12 = vrot.lane.b32.xlu0 %v11_v1, %s39_s0  ;;  %24 = vrot.lane.b32.xlu1 %v23_v2, %s40_s8  ;;  %v17_v4 = vld [vmem:[#allocation1 + $0x2] sm:$0x1]   ;;  %9 = vst.msk [vmem:[#allocation0] sm:$0x1] %vm8_vm0, %v7_v3  }
   0xe   :  { %18 = vrot.lane.b32.xlu0 %v17_v4, %s41_s9 }
  0x7c   :  { %v13_v5 = vpop.permute.xlu0 %12   ;;  %v25_v6 = vpop.permute.xlu1 %24  }
  0x7d   :  { %15 = vst.msk [vmem:[#allocation0] sm:$0x1] %vm14_vm1, %v13_v5  }
  0x80   :  { %v19_v7 = vpop.permute.xlu0 %18  }
  0x81   :  { %21 = vst.msk [vmem:[#allocation0] sm:$0x1] %vm20_vm2, %v19_v7  }
  0x82   :  { %27 = vst.msk [vmem:[#allocation0] sm:$0x1] %vm26_vm3, %v25_v6  }
  0x89   :  { %v32_v8 = vld [vmem:[#allocation0] sm:$0x1] }
  0x8a   :  { %35 = vst [vmem:[%s59_s1] sm:$0x1] %v32_v8 }

// kernel: atom_encoder.1
= control target key start
LH: loop header
LB: loop body
LE: loop exit
PB: predicated region body
PF: predicated region fallthrough
CT: control target
= control target key end

     0   :  { %v264_v0 = vmov 0   ;;  %vm140_vm0 = vcmask 785408   ;;  %s376_s1 = inlined_call_operand.vmem [shape: bf16[224,128], index: 1, kind: input, shape index: {}]   ;;  %s377_s0 = inlined_call_operand.vmem [shape: s8[32,224], index: 0, kind: input, shape index: {}]   ;;  %s378_s2 = inlined_call_operand.vmem [shape: f32[1,128], index: 2, kind: input, shape index: {}]   ;;  %s379_s3 = inlined_call_operand.vmem [shape: f32[32,128], index: 3, kind: output, shape index: {}]  }
   0x1   :  { %147 = vmatprep.subr.bf16.mxu0 %v264_v0  ;;  %221 = vmatprep.subr.bf16.mxu1 %v264_v0  ;;  %v250_v1 = vld [vmem:[%s376_s1 + $0x38] sm:$0xff]   ;;  %v251_v2 = vld [vmem:[%s376_s1 + $0x30] sm:$0xff]   ;;  %v252_v3 = vld [vmem:[%s376_s1 + $0x28] sm:$0xff]  }
   0x2   :  { %148 = vmatpush1.bf16.msra.mxu0 %v250_v1  ;;  %235 = vmatpush1.bf16.msra.mxu1 %v250_v1  ;;  %v253_v4 = vld [vmem:[%s376_s1 + $0x20] sm:$0xff]   ;;  %v254_v5 = vld [vmem:[%s376_s1 + $0x18] sm:$0xff]   ;;  %v16_v6 = vld [vmem:[%s377_s0 + $0x8] sm:$0xff] }
   0x3   :  { %149 = vmatprep.subr.bf16.mxu0 %v264_v0  ;;  %222 = vmatprep.subr.bf16.mxu1 %v264_v0  ;;  %v18_v7 = vunpack.c.l.s8.bf16 %v16_v6  ;;  %v20_v8 = vunpack.c.h.s8.bf16 %v16_v6  ;;  %v255_v9 = vld [vmem:[%s376_s1 + $0x10] sm:$0xff]   ;;  %v256_v10 = vld [vmem:[%s376_s1 + $0x8] sm:$0xff]   ;;  %v257_v11 = vld [vmem:[%s376_s1] sm:$0xff]  }
   0x4   :  { %v258_v12 = vld [vmem:[%s376_s1 + $0x68] sm:$0xff]   ;;  %v259_v13 = vld [vmem:[%s376_s1 + $0x60] sm:$0xff]   ;;  %v260_v14 = vld [vmem:[%s376_s1 + $0x58] sm:$0xff]  }
   0x5   :  { %219 = vmatprep.mubr.msk.bf16.mxu0 %vm140_vm0, %v18_v7  ;;  %220 = vmatprep.mubr.msk.bf16.mxu1 %vm140_vm0, %v20_v8  ;;  %v261_v15 = vld [vmem:[%s376_s1 + $0x50] sm:$0xff]   ;;  %v262_v16 = vld [vmem:[%s376_s1 + $0x48] sm:$0xff]   ;;  %v263_v17 = vld [vmem:[%s376_s1 + $0x40] sm:$0xff]  }
   0x6   :  { %150 = vmatpush1.bf16.msra.mxu0 %v251_v2  ;;  %236 = vmatpush1.bf16.msra.mxu1 %v251_v2  ;;  %v15_v18 = vld [vmem:[%s377_s0] sm:$0xff] }
   0x7   :  { %151 = vmatprep.subr.bf16.mxu0 %v264_v0  ;;  %223 = vmatprep.subr.bf16.mxu1 %v264_v0  ;;  %v17_v19 = vunpack.c.l.s8.bf16 %v15_v18  ;;  %v19_v20 = vunpack.c.h.s8.bf16 %v15_v18  ;;  %v204_v21 = vld [vmem:[%s378_s2] ss:$0 sm:$0xff] }
   0xa   :  { %152 = vmatpush1.bf16.msra.mxu0 %v252_v3  ;;  %237 = vmatpush1.bf16.msra.mxu1 %v252_v3 }
   0xb   :  { %153 = vmatprep.subr.bf16.mxu0 %v264_v0  ;;  %224 = vmatprep.subr.bf16.mxu1 %v264_v0 }
   0xe   :  { %154 = vmatpush1.bf16.msra.mxu0 %v253_v4  ;;  %238 = vmatpush1.bf16.msra.mxu1 %v253_v4 }
   0xf   :  { %155 = vmatprep.subr.bf16.mxu0 %v264_v0  ;;  %225 = vmatprep.subr.bf16.mxu1 %v264_v0 }
  0x12   :  { %156 = vmatpush1.bf16.msra.mxu0 %v254_v5  ;;  %239 = vmatpush1.bf16.msra.mxu1 %v254_v5 }
  0x13   :  { %157 = vmatprep.subr.bf16.mxu0 %v264_v0  ;;  %226 = vmatprep.subr.bf16.mxu1 %v264_v0 }
  0x16   :  { %158 = vmatpush1.bf16.msra.mxu0 %v255_v9  ;;  %240 = vmatpush1.bf16.msra.mxu1 %v255_v9 }
  0x17   :  { %159 = vmatprep.subr.bf16.mxu0 %v264_v0  ;;  %227 = vmatprep.subr.bf16.mxu1 %v264_v0 }
  0x1a   :  { %160 = vmatpush1.bf16.msra.mxu0 %v256_v10  ;;  %241 = vmatpush1.bf16.msra.mxu1 %v256_v10 }
  0x1b   :  { %161 = vmatprep.subr.bf16.mxu0 %v264_v0  ;;  %228 = vmatprep.subr.bf16.mxu1 %v264_v0 }
  0x1e   :  { %162 = vmatpush1.bf16.msra.mxu0 %v257_v11  ;;  %242 = vmatpush1.bf16.msra.mxu1 %v257_v11 }
  0x1f   :  { %167 = vmatprep.subr.bf16.mxu0 %v264_v0  ;;  %229 = vmatprep.subr.bf16.mxu1 %v264_v0 }
  0x22   :  { %168 = vmatpush2.bf16.msra.mxu0 %v258_v12  ;;  %243 = vmatpush2.bf16.msra.mxu1 %v258_v12 }
  0x23   :  { %169 = vmatprep.subr.bf16.mxu0 %v264_v0  ;;  %230 = vmatprep.subr.bf16.mxu1 %v264_v0 }
  0x26   :  { %170 = vmatpush2.bf16.msra.mxu0 %v259_v13  ;;  %244 = vmatpush2.bf16.msra.mxu1 %v259_v13 }
  0x27   :  { %171 = vmatprep.subr.bf16.mxu0 %v264_v0  ;;  %231 = vmatprep.subr.bf16.mxu1 %v264_v0 }
  0x2a   :  { %172 = vmatpush2.bf16.msra.mxu0 %v260_v14  ;;  %245 = vmatpush2.bf16.msra.mxu1 %v260_v14 }
  0x2b   :  { %173 = vmatprep.subr.bf16.mxu0 %v264_v0  ;;  %232 = vmatprep.subr.bf16.mxu1 %v264_v0 }
  0x2e   :  { %174 = vmatpush2.bf16.msra.mxu0 %v261_v15  ;;  %246 = vmatpush2.bf16.msra.mxu1 %v261_v15 }
  0x2f   :  { %175 = vmatprep.subr.bf16.mxu0 %v264_v0  ;;  %233 = vmatprep.subr.bf16.mxu1 %v264_v0 }
  0x32   :  { %176 = vmatpush2.bf16.msra.mxu0 %v262_v16  ;;  %247 = vmatpush2.bf16.msra.mxu1 %v262_v16 }
  0x33   :  { %177 = vmatprep.subr.bf16.mxu0 %v264_v0  ;;  %234 = vmatprep.subr.bf16.mxu1 %v264_v0 }
  0x36   :  { %178 = vmatpush2.bf16.msra.mxu0 %v263_v17  ;;  %248 = vmatpush2.bf16.msra.mxu1 %v263_v17 }
  0x39   :  { %180 = vmatmul.mubr.bf16.vlgmr.msra.gmra.mxu0 %v17_v19  ;;  %188 = vmatmul.mubr.bf16.vlgmr.msra.gmra.mxu1 %v19_v20 }
  0xf9   :  { %v181_v22 = vpop.f32.mrf.mxu0  ;;  %v189_v23 = vpop.f32.mrf.mxu1 }
  0xfa   :  { %v182_v24 = vadd.f32 %v204_v21, %v181_v22  ;;  %v190_v25 = vadd.f32 %v204_v21, %v189_v23 }
  0xfb   :  { %v183_v26 = vpop.f32.mrf.mxu0  ;;  %v191_v27 = vpop.f32.mrf.mxu1 }
  0xfc   :  { %196 = vst [vmem:[%s379_s3] sm:$0xff] %v182_v24  ;;  %198 = vst [vmem:[%s379_s3 + $0x10] sm:$0xff] %v190_v25 }
  0xfd   :  { %v184_v28 = vpop.f32.mrf.mxu0  ;;  %v192_v29 = vpop.f32.mrf.mxu1 }
  0xfe   :  { %v185_v30 = vadd.f32 %v204_v21, %v184_v28  ;;  %v193_v31 = vadd.f32 %v204_v21, %v192_v29 }
  0xff   :  { %v186_v32 = vpop.f32.mrf.mxu0  ;;  %v194_v33 = vpop.f32.mrf.mxu1 }
 0x100   :  { %197 = vst [vmem:[%s379_s3 + $0x8] sm:$0xff] %v185_v30  ;;  %199 = vst [vmem:[%s379_s3 + $0x18] sm:$0xff] %v193_v31 }

</bundles_post_ra>
